<compile_context>
chip_gen: v5e
topology: v5e:2x2
jax: 0.10.0
libtpu: 0.0.40
codegen_flags: <defaults>
</compile_context>

<pallas_src>
import functools

import jax
import jax.numpy as jnp
from jax.experimental import pallas as pl
from jax.experimental.pallas import tpu as pltpu

LANE = 128
SUBLANE = 8


def _round_up(x, m):
    return ((x + m - 1) // m) * m


def _pick_batch_tile(B, max_tile=2048):
    """Pick (batch_tile, padded_batch). Prefers big tiles, >=2 grid steps
    (v7x megacore) and <=12.5% padding waste."""
    b8 = _round_up(max(B, 1), SUBLANE)
    tb = max_tile
    while tb >= SUBLANE:
        if tb <= b8:
            b_pad = _round_up(B, tb)
            n_tiles = b_pad // tb
            waste = (b_pad - B) / max(B, 1)
            if n_tiles >= 2 and waste <= 0.125:
                return tb, b_pad
        tb //= 2
    return b8, b8          # tiny batch: one tile


# ----------------------------------------------------------------------------
# Pallas kernel: fused  one-hot-embedding + backbone (Linear+ReLU) + head
# ----------------------------------------------------------------------------
def _fused_tabular_kernel(n_cat, cat_ref, cont_ref, w1cat_ref, w1cont_ref,
                          b1_ref, w2_ref, b2_ref, out_ref):
    """One batch tile.

    cat_ref    : [TB, n_cat]      int32  absolute one-hot lane indices (-1 = none)
    cont_ref   : [TB, n_cont_pad] bf16   compact continuous features (zero padded)
    w1cat_ref  : [C_oh, W]        bf16   per-category rows = emb_table @ W1_emb
    w1cont_ref : [n_cont_pad, W]  bf16   continuous-feature rows of W1
    b1_ref     : [1, W]           f32    lanes [0:hidden) = b1, rest 0
    w2_ref     : [W, W]           bf16   rows [0:hidden), cols [hidden:hidden+out)
    b2_ref     : [1, W]           f32    lanes [hidden:hidden+out) = b2, rest 0
    out_ref    : [TB, W]          bf16   lanes [0:hidden)=features,
                                         lanes [hidden:hidden+out)=logits
    """
    tb = cat_ref.shape[0]
    c_oh = w1cat_ref.shape[0]

    # One-hot of all categorical features, built directly in bf16 (0/1 exact).
    lanes = jax.lax.broadcasted_iota(jnp.int32, (tb, c_oh), 1)
    idx = cat_ref[...]
    onehot = jnp.zeros((tb, c_oh), jnp.bfloat16)
    for i in range(n_cat):                               # static unroll, tiny n_cat
        onehot = onehot + (lanes == idx[:, i:i + 1]).astype(jnp.bfloat16)

    # Backbone: (one_hot @ folded-W1) + (cont @ W1_cont) + b1 -> ReLU (f32 acc).
    h = jnp.dot(onehot, w1cat_ref[...], preferred_element_type=jnp.float32)
    h = h + jnp.dot(cont_ref[...], w1cont_ref[...],
                    preferred_element_type=jnp.float32)
    h = jnp.maximum(h + b1_ref[...], 0.0)                # lanes >= hidden stay 0

    # Head: logits land in lanes [hidden:hidden+out); all other lanes are 0.
    y = jnp.dot(h.astype(jnp.bfloat16), w2_ref[...],
                preferred_element_type=jnp.float32) + b2_ref[...]

    # Merged writeback (features | logits) as a single lane-dense bf16 store.
    out_ref[...] = (h + y).astype(out_ref.dtype)


def fused_tabular_forward(cat_abs, cont, w1cat, w1cont, b1, w2, b2, batch_tile):
    """Returns merged [B_pad, W] bf16: lanes [0:H)=features, [H:H+O)=logits."""
    b_pad, n_cat = cat_abs.shape
    n_cont_pad = cont.shape[1]
    c_oh, w = w1cat.shape
    assert b_pad % batch_tile == 0
    grid = (b_pad // batch_tile,)

    kernel = functools.partial(_fused_tabular_kernel, n_cat)

    flops = 2 * b_pad * (c_oh + n_cont_pad + w) * w
    bytes_accessed = (cat_abs.size * 4 + cont.size * 2 + w1cat.size * 2 +
                      w1cont.size * 2 + b1.size * 4 + w2.size * 2 +
                      b2.size * 4 + b_pad * w * 2)

    return pl.pallas_call(
        kernel,
        out_shape=jax.ShapeDtypeStruct((b_pad, w), jnp.bfloat16),
        grid_spec=pltpu.PrefetchScalarGridSpec(
            num_scalar_prefetch=0,
            grid=grid,
            in_specs=[
                # batch-tiled activations (last dim == full array dim)
                pl.BlockSpec((batch_tile, n_cat), lambda i: (i, 0)),
                pl.BlockSpec((batch_tile, n_cont_pad), lambda i: (i, 0)),
                # weights/biases: resident in VMEM across all grid steps
                pl.BlockSpec((c_oh, w), lambda i: (0, 0)),
                pl.BlockSpec((n_cont_pad, w), lambda i: (0, 0)),
                pl.BlockSpec((1, w), lambda i: (0, 0)),
                pl.BlockSpec((w, w), lambda i: (0, 0)),
                pl.BlockSpec((1, w), lambda i: (0, 0)),
            ],
            out_specs=pl.BlockSpec((batch_tile, w), lambda i: (i, 0)),
        ),
        compiler_params=pltpu.CompilerParams(
            dimension_semantics=("parallel",),      # megacore split on v7x
            vmem_limit_bytes=32 * 1024 * 1024,      # safe on v7x's 64 MiB VMEM
        ),
        cost_estimate=pl.CostEstimate(flops=flops, transcendentals=0,
                                      bytes_accessed=bytes_accessed),
    )(cat_abs, cont, w1cat, w1cont, b1, w2, b2)


# ----------------------------------------------------------------------------
# Model wrapper (parameter setup + folding/padding glue in plain JAX)
# ----------------------------------------------------------------------------
class PallasTabularModel:
    def __init__(self, key, continuous_dim, cardinalities, embedding_dims,
                 hidden_dim, output_dim, max_batch_tile=2048):
        self.continuous_dim = continuous_dim
        self.cardinalities = list(cardinalities)
        self.embedding_dims = list(embedding_dims)
        self.hidden_dim = hidden_dim
        self.output_dim = output_dim
        self.max_batch_tile = max_batch_tile

        d_emb = sum(embedding_dims)
        d_in = continuous_dim + d_emb
        keys = jax.random.split(key, 5 + max(len(cardinalities), 1))

        # Canonical parameters (nn.Embedding / nn.Linear shapes & semantics).
        self.cat_embedding_tables = [
            0.1 * jax.random.normal(keys[i], (card, dim), dtype=jnp.float32)
            for i, (card, dim) in enumerate(zip(cardinalities, embedding_dims))
        ]
        k_w1, k_b1, k_w2, k_b2 = keys[-5], keys[-4], keys[-3], keys[-2]
        self.w1 = (jax.random.normal(k_w1, (d_in, hidden_dim), jnp.float32)
                   / jnp.sqrt(jnp.float32(d_in)))
        self.b1 = 0.1 * jax.random.normal(k_b1, (1, hidden_dim), jnp.float32)
        self.w2 = (jax.random.normal(k_w2, (hidden_dim, output_dim), jnp.float32)
                   / jnp.sqrt(jnp.float32(hidden_dim)))
        self.b2 = 0.1 * jax.random.normal(k_b2, (1, output_dim), jnp.float32)

        # ---- kernel-side (folded, lane-padded) parameters --------------------
        self.n_onehot = sum(cardinalities)
        self.n_cat_k = max(len(cardinalities), 1)
        offs, acc = [], 0
        for card in cardinalities:
            offs.append(acc)
            acc += card
        self.cat_offsets = tuple(offs)

        self.C_oh = _round_up(max(self.n_onehot, 1), LANE)
        self.n_cont_pad = _round_up(max(continuous_dim, 1), 16)
        # Merged output width: features + logits share one 128-lane-padded slab.
        self.W = _round_up(hidden_dim + output_dim, LANE)

        # Fold each embedding table through its W1 block:
        #   (one_hot @ table) @ W1_block == one_hot @ (table @ W1_block)
        w1cat = jnp.zeros((self.C_oh, self.W), jnp.float32)
        row, col = 0, 0
        for tbl, card, dim in zip(self.cat_embedding_tables,
                                  cardinalities, embedding_dims):
            w1cat = w1cat.at[row:row + card, :hidden_dim].set(
                tbl @ self.w1[col:col + dim, :])
            row += card
            col += dim
        self.w1_cat = w1cat.astype(jnp.bfloat16)

        w1cont = jnp.zeros((self.n_cont_pad, self.W), jnp.float32)
        if continuous_dim > 0:
            w1cont = w1cont.at[:continuous_dim, :hidden_dim].set(self.w1[d_emb:, :])
        self.w1_cont = w1cont.astype(jnp.bfloat16)

        self.b1_pad = jnp.zeros((1, self.W), jnp.float32
                                ).at[:, :hidden_dim].set(self.b1)
        w2p = jnp.zeros((self.W, self.W), jnp.float32)
        w2p = w2p.at[:hidden_dim,
                     hidden_dim:hidden_dim + output_dim].set(self.w2)
        self.w2_pad = w2p.astype(jnp.bfloat16)
        self.b2_pad = jnp.zeros((1, self.W), jnp.float32
                                ).at[:, hidden_dim:hidden_dim + output_dim
                                     ].set(self.b2)

    # forward: embed -> backbone -> head -> pack_output (fully fused kernel)
    def forward(self, x):
        cont = x["continuous"].astype(jnp.float32)             # [B, n_cont]
        cat = x["categorical"].astype(jnp.int32)                # [B, n_cat]
        B = cont.shape[0]
        tb, b_pad = _pick_batch_tile(B, self.max_batch_tile)

        # Absolute one-hot lane indices (clamped to cardinality) host/XLA-side.
        if len(self.cardinalities) > 0:
            cards = jnp.asarray(self.cardinalities, jnp.int32)[None, :]
            offs = jnp.asarray(self.cat_offsets, jnp.int32)[None, :]
            cat_abs = jnp.clip(cat, 0, cards - 1) + offs        # [B, n_cat]
        else:
            cat_abs = jnp.full((B, 1), -1, jnp.int32)
        cat_abs_pad = jnp.full((b_pad, self.n_cat_k), -1, jnp.int32)
        cat_abs_pad = cat_abs_pad.at[:B, :cat_abs.shape[1]].set(cat_abs)

        # Compact continuous features (no 96%-zero lane padding).
        cont_pad = jnp.zeros((b_pad, self.n_cont_pad), jnp.bfloat16)
        if self.continuous_dim > 0:
            cont_pad = cont_pad.at[:B, :self.continuous_dim].set(
                cont.astype(jnp.bfloat16))

        merged = fused_tabular_forward(cat_abs_pad, cont_pad, self.w1_cat,
                                       self.w1_cont, self.b1_pad, self.w2_pad,
                                       self.b2_pad, tb)

        h = self.hidden_dim
        # pack_output semantics
        return {
            "logits": merged[:B, h:h + self.output_dim].astype(jnp.float32),
            "backbone_features": merged[:B, :h].astype(jnp.float32),
        }

    # Pure-JAX reference (literal embed -> Linear/ReLU -> Linear), f32.
    def forward_reference(self, x):
        cont = x["continuous"].astype(jnp.float32)
        cat = x["categorical"]
        emb = [jnp.take(tbl, cat[:, i], axis=0)
               for i, tbl in enumerate(self.cat_embedding_tables)]
        z = jnp.concatenate(emb + [cont], axis=-1)
        h = jnp.maximum(z @ self.w1 + self.b1, 0.0)
        return {"logits": h @ self.w2 + self.b2, "backbone_features": h}

    def predict(self, x, ret_model_output=False):
        ret_value = self.forward(x)
        if ret_model_output:
            return ret_value["logits"], ret_value
        return ret_value["logits"]


# ----------------------------------------------------------------------------
if __name__ == "__main__":
    key = jax.random.PRNGKey(0)
    k_model, k_cont, k_cat = jax.random.split(key, 3)

    batch = 8
    continuous_dim = 4
    cardinalities = [5, 7, 3]
    embedding_dims = [4, 4, 4]       # D_in = 4 + 12 = 16
    hidden_dim = 32
    output_dim = 2

    model = PallasTabularModel(k_model, continuous_dim, cardinalities,
                               embedding_dims, hidden_dim, output_dim)

    x = {
        "continuous": jax.random.normal(k_cont, (batch, continuous_dim),
                                        jnp.float32),
        "categorical": jnp.stack(
            [jax.random.randint(jax.random.fold_in(k_cat, i), (batch,), 0, card)
             for i, card in enumerate(cardinalities)], axis=-1).astype(jnp.int32),
    }

    out = model.forward(x)
    jax.block_until_ready(out["logits"])
    jax.block_until_ready(out["backbone_features"])

    assert out["logits"].shape == (batch, output_dim)
    assert out["backbone_features"].shape == (batch, hidden_dim)

    # Numerical self-check against the literal (unfused, f32) forward.
    # bf16 weight folding / activation storage => ~1e-2 relative error budget.
    ref = model.forward_reference(x)
    assert jnp.allclose(out["logits"], ref["logits"], rtol=5e-2, atol=5e-2)
    assert jnp.allclose(out["backbone_features"], ref["backbone_features"],
                        rtol=5e-2, atol=5e-2)

    # TODO(synk): compute_loss / feature_importance / reset_weights /
    # extract_embedding / data_aware_initialization are training/analysis-time
    # utilities, not part of the forward hot path; not implemented as kernels.
    print("KERNEL_OK")
</pallas_src>

<mosaic_0001>
module attributes {stable_mosaic.version = 11 : i64} {
  func.func @_fused_tabular_kernel(%arg0: i32, %arg1: memref<8x3xi32, #tpu.memory_space<vmem>>, %arg2: memref<8x16xbf16, #tpu.memory_space<vmem>>, %arg3: memref<128x128xbf16, #tpu.memory_space<vmem>>, %arg4: memref<16x128xbf16, #tpu.memory_space<vmem>>, %arg5: memref<1x128xf32, #tpu.memory_space<vmem>>, %arg6: memref<128x128xbf16, #tpu.memory_space<vmem>>, %arg7: memref<1x128xf32, #tpu.memory_space<vmem>>, %arg8: memref<8x128xbf16, #tpu.memory_space<vmem>>) attributes {dimension_semantics = [#tpu.dimension_semantics<parallel>], iteration_bounds = array<i64: 1>, scalar_prefetch = 0 : i64, scratch_operands = 0 : i64, tpu.core_type = #tpu.core_type<tc>, window_params = [{transform_indices = @transform_0, window_bounds = array<i64: 8, 3>}, {transform_indices = @transform_1, window_bounds = array<i64: 8, 16>}, {pipeline_mode = #tpu.pipeline_mode<synchronous>, transform_indices = @transform_2, window_bounds = array<i64: 128, 128>}, {pipeline_mode = #tpu.pipeline_mode<synchronous>, transform_indices = @transform_3, window_bounds = array<i64: 16, 128>}, {pipeline_mode = #tpu.pipeline_mode<synchronous>, transform_indices = @transform_4, window_bounds = array<i64: 1, 128>}, {pipeline_mode = #tpu.pipeline_mode<synchronous>, transform_indices = @transform_5, window_bounds = array<i64: 128, 128>}, {pipeline_mode = #tpu.pipeline_mode<synchronous>, transform_indices = @transform_6, window_bounds = array<i64: 1, 128>}, {transform_indices = @transform_7, window_bounds = array<i64: 8, 128>}]} {
    %0 = tpu.iota {dimensions = array<i32: 1>} : vector<8x128xi32>
    %c0 = arith.constant 0 : index
    %c0_0 = arith.constant 0 : index
    %1 = vector.load %arg1[%c0, %c0_0] : memref<8x3xi32, #tpu.memory_space<vmem>>, vector<8x3xi32>
    %cst = arith.constant 0.000000e+00 : bf16
    %2 = vector.broadcast %cst : bf16 to vector<8x128xbf16>
    %3 = vector.extract_strided_slice %1 {offsets = [0, 0], sizes = [8, 1], strides = [1, 1]} : vector<8x3xi32> to vector<8x1xi32>
    %4 = vector.broadcast %3 : vector<8x1xi32> to vector<8x128xi32>
    %5 = arith.cmpi eq, %0, %4 : vector<8x128xi32>
    %6 = arith.extui %5 : vector<8x128xi1> to vector<8x128xi32>
    %7 = arith.sitofp %6 : vector<8x128xi32> to vector<8x128xf32>
    %8 = arith.truncf %7 : vector<8x128xf32> to vector<8x128xbf16>
    %9 = arith.addf %2, %8 : vector<8x128xbf16>
    %10 = vector.extract_strided_slice %1 {offsets = [0, 1], sizes = [8, 1], strides = [1, 1]} : vector<8x3xi32> to vector<8x1xi32>
    %11 = vector.broadcast %10 : vector<8x1xi32> to vector<8x128xi32>
    %12 = arith.cmpi eq, %0, %11 : vector<8x128xi32>
    %13 = arith.extui %12 : vector<8x128xi1> to vector<8x128xi32>
    %14 = arith.sitofp %13 : vector<8x128xi32> to vector<8x128xf32>
    %15 = arith.truncf %14 : vector<8x128xf32> to vector<8x128xbf16>
    %16 = arith.addf %9, %15 : vector<8x128xbf16>
    %17 = vector.extract_strided_slice %1 {offsets = [0, 2], sizes = [8, 1], strides = [1, 1]} : vector<8x3xi32> to vector<8x1xi32>
    %18 = vector.broadcast %17 : vector<8x1xi32> to vector<8x128xi32>
    %19 = arith.cmpi eq, %0, %18 : vector<8x128xi32>
    %20 = arith.extui %19 : vector<8x128xi1> to vector<8x128xi32>
    %21 = arith.sitofp %20 : vector<8x128xi32> to vector<8x128xf32>
    %22 = arith.truncf %21 : vector<8x128xf32> to vector<8x128xbf16>
    %23 = arith.addf %16, %22 : vector<8x128xbf16>
    %c0_1 = arith.constant 0 : index
    %c0_2 = arith.constant 0 : index
    %24 = vector.load %arg3[%c0_1, %c0_2] : memref<128x128xbf16, #tpu.memory_space<vmem>>, vector<128x128xbf16>
    %cst_3 = arith.constant dense<0.000000e+00> : vector<8x128xf32>
    %25 = tpu.matmul %23, %24, %cst_3 {dimension_numbers = #tpu.dot_dimension_numbers<[1], [0], [0], [1], [0, 0, 1, 1], [], []>} : vector<8x128xbf16>, vector<128x128xbf16>, vector<8x128xf32> -> vector<8x128xf32>
    %c0_4 = arith.constant 0 : index
    %c0_5 = arith.constant 0 : index
    %26 = vector.load %arg2[%c0_4, %c0_5] : memref<8x16xbf16, #tpu.memory_space<vmem>>, vector<8x16xbf16>
    %c0_6 = arith.constant 0 : index
    %c0_7 = arith.constant 0 : index
    %27 = vector.load %arg4[%c0_6, %c0_7] : memref<16x128xbf16, #tpu.memory_space<vmem>>, vector<16x128xbf16>
    %cst_8 = arith.constant dense<0.000000e+00> : vector<8x128xf32>
    %28 = tpu.matmul %26, %27, %cst_8 {dimension_numbers = #tpu.dot_dimension_numbers<[1], [0], [0], [1], [0, 0, 1, 1], [], []>} : vector<8x16xbf16>, vector<16x128xbf16>, vector<8x128xf32> -> vector<8x128xf32>
    %29 = arith.addf %25, %28 : vector<8x128xf32>
    %c0_9 = arith.constant 0 : index
    %c0_10 = arith.constant 0 : index
    %30 = vector.load %arg5[%c0_9, %c0_10] : memref<1x128xf32, #tpu.memory_space<vmem>>, vector<1x128xf32>
    %31 = vector.broadcast %30 : vector<1x128xf32> to vector<8x128xf32>
    %32 = arith.addf %29, %31 : vector<8x128xf32>
    %cst_11 = arith.constant 0.000000e+00 : f32
    %33 = vector.broadcast %cst_11 : f32 to vector<8x128xf32>
    %34 = arith.maximumf %32, %33 : vector<8x128xf32>
    %35 = arith.truncf %34 : vector<8x128xf32> to vector<8x128xbf16>
    %c0_12 = arith.constant 0 : index
    %c0_13 = arith.constant 0 : index
    %36 = vector.load %arg6[%c0_12, %c0_13] : memref<128x128xbf16, #tpu.memory_space<vmem>>, vector<128x128xbf16>
    %cst_14 = arith.constant dense<0.000000e+00> : vector<8x128xf32>
    %37 = tpu.matmul %35, %36, %cst_14 {dimension_numbers = #tpu.dot_dimension_numbers<[1], [0], [0], [1], [0, 0, 1, 1], [], []>} : vector<8x128xbf16>, vector<128x128xbf16>, vector<8x128xf32> -> vector<8x128xf32>
    %c0_15 = arith.constant 0 : index
    %c0_16 = arith.constant 0 : index
    %38 = vector.load %arg7[%c0_15, %c0_16] : memref<1x128xf32, #tpu.memory_space<vmem>>, vector<1x128xf32>
    %39 = vector.broadcast %38 : vector<1x128xf32> to vector<8x128xf32>
    %40 = arith.addf %37, %39 : vector<8x128xf32>
    %41 = arith.addf %34, %40 : vector<8x128xf32>
    %42 = arith.truncf %41 : vector<8x128xf32> to vector<8x128xbf16>
    %c0_17 = arith.constant 0 : index
    %c0_18 = arith.constant 0 : index
    %43 = vector.load %arg8[%c0_17, %c0_18] : memref<8x128xbf16, #tpu.memory_space<vmem>>, vector<8x128xbf16>
    tpu.vector_store %arg8[%c0_17, %c0_18], %42 {strides = array<i32>} : memref<8x128xbf16, #tpu.memory_space<vmem>>, vector<8x128xbf16>,
    return
  }
  func.func @transform_0(%arg0: i32) -> (i32, i32) {
    %c0_i32 = arith.constant 0 : i32
    %c0_i32_0 = arith.constant 0 : i32
    return %arg0, %c0_i32 : i32, i32
  }
  func.func @transform_1(%arg0: i32) -> (i32, i32) {
    %c0_i32 = arith.constant 0 : i32
    %c0_i32_0 = arith.constant 0 : i32
    return %arg0, %c0_i32 : i32, i32
  }
  func.func @transform_2(%arg0: i32) -> (i32, i32) {
    %c0_i32 = arith.constant 0 : i32
    %c0_i32_0 = arith.constant 0 : i32
    %c0_i32_1 = arith.constant 0 : i32
    return %c0_i32, %c0_i32_0 : i32, i32
  }
  func.func @transform_3(%arg0: i32) -> (i32, i32) {
    %c0_i32 = arith.constant 0 : i32
    %c0_i32_0 = arith.constant 0 : i32
    %c0_i32_1 = arith.constant 0 : i32
    return %c0_i32, %c0_i32_0 : i32, i32
  }
  func.func @transform_4(%arg0: i32) -> (i32, i32) {
    %c0_i32 = arith.constant 0 : i32
    %c0_i32_0 = arith.constant 0 : i32
    %c0_i32_1 = arith.constant 0 : i32
    return %c0_i32, %c0_i32_0 : i32, i32
  }
  func.func @transform_5(%arg0: i32) -> (i32, i32) {
    %c0_i32 = arith.constant 0 : i32
    %c0_i32_0 = arith.constant 0 : i32
    %c0_i32_1 = arith.constant 0 : i32
    return %c0_i32, %c0_i32_0 : i32, i32
  }
  func.func @transform_6(%arg0: i32) -> (i32, i32) {
    %c0_i32 = arith.constant 0 : i32
    %c0_i32_0 = arith.constant 0 : i32
    %c0_i32_1 = arith.constant 0 : i32
    return %c0_i32, %c0_i32_0 : i32, i32
  }
  func.func @transform_7(%arg0: i32) -> (i32, i32) {
    %c0_i32 = arith.constant 0 : i32
    %c0_i32_0 = arith.constant 0 : i32
    return %arg0, %c0_i32 : i32, i32
  }
}

</mosaic_0001>

<bundles_post_ra>
// kernel: tpu_custom_call.1
= control target key start
LH: loop header
LB: loop body
LE: loop exit
PB: predicated region body
PF: predicated region fallthrough
CT: control target
= control target key end

     0   :  { %12 = vsyncpa [#allocation3], 0  ;;  %s562_s0 = inlined_call_operand.vmem [shape: s32[8,3], index: 0, kind: input, shape index: {}]   ;;  %s563_s1 = inlined_call_operand.vmem [shape: bf16[8,16], index: 1, kind: input, shape index: {}]   ;;  %s564_s2 = inlined_call_operand.hbm [shape: bf16[128,128], index: 2, kind: input, shape index: {}]   ;;  %s565_s3 = inlined_call_operand.vmem [shape: bf16[16,128], index: 3, kind: input, shape index: {}]   ;;  %s566_s4 = inlined_call_operand.vmem [shape: f32[1,128], index: 4, kind: input, shape index: {}]   ;;  %s567_s5 = inlined_call_operand.hbm [shape: bf16[128,128], index: 5, kind: input, shape index: {}]   ;;  %s568_s6 = inlined_call_operand.vmem [shape: f32[1,128], index: 6, kind: input, shape index: {}]   ;;  %s569_s7 = inlined_call_operand.hbm [shape: bf16[8,128], index: 7, kind: output, shape index: {}]  }
   0x1   :  { %13 = vsyncpa [#allocation6], 0 }
   0x2   :  { %14 = vsyncpa [#allocation4], 0  ;;  %s23_s26 = sshll.u32 %s564_s2, 4  ;;  %s489_s27 = smov [#allocation2]   ;;  %s24_s26 = int_to_ptr.hbm [resolvable:$true] %s23_s26 }
   0x3   :  { %s25_s28 = sshll.u32 %s489_s27, 4  ;;  %s40_s8 = sshll.u32 %s567_s5, 4  ;;  %s26_s28 = int_to_ptr.vmem [resolvable:$true] %s25_s28  ;;  %s41_s8 = int_to_ptr.hbm [resolvable:$true] %s40_s8 }
   0x4   :  { %s490_s9 = smov 64   ;;  %s491_s10 = smov 4  }
   0x5   :  { %31 = dma.hbm_to_vmem [thread:$0]  %s24_s26, 1024, %s26_s28, [#allocation3], %s490_s9, %s490_s9, %s491_s10  }
   0x6   :  { %s492_s11 = smov [#allocation5]  }
   0x7   :  { %s42_s12 = sshll.u32 %s492_s11, 4  ;;  %s43_s12 = int_to_ptr.vmem [resolvable:$true] %s42_s12 }
   0x8   :  { %48 = dma.hbm_to_vmem [thread:$0]  %s41_s8, 1024, %s43_s12, [#allocation6], %s490_s9, %s490_s9, %s491_s10  }
   0x9   :  { %483 = dma.done.wait [#allocation3], 1024  }
   0xa   :  { %484 = vsyncadd [#allocation3], 4294966272 }
   0xb   :  { %485 = dma.done.wait [#allocation6], 1024  }
   0xc   :  { %486 = vsyncadd [#allocation6], 4294966272  ;;  %v493_v0 = vmov 0   ;;  %v494_v1 = vmov 2   ;;  %v62_v2 = vld [vmem:[%s562_s0] sm:$0xff]  ;;  %v386_v3 = vld [vmem:[#allocation2 + $0x38] sm:$0xff]  ;;  %v60_v17 = vlaneseq }
   0xd   :  { %405 = vset.pattern.permute.xlu0 %v493_v0  ;;  %407 = vset.pattern.permute.xlu1 %v494_v1  ;;  %v385_v4 = vld [vmem:[#allocation2 + $0x30] sm:$0xff]  ;;  %v384_v5 = vld [vmem:[#allocation2 + $0x28] sm:$0xff]  ;;  %v495_v6 = vmov 1   ;;  %v383_v7 = vld [vmem:[#allocation2 + $0x20] sm:$0xff]  ;;  %vm120_vm0 = vcmask 130048   ;;  %v496_v23 = vmov 0.0  }
   0xe   :  { %64 = vperm.xlu0 %405, %v62_v2   ;;  %85 = vperm.xlu1 %407, %v62_v2   ;;  %v382_v8 = vld [vmem:[#allocation2 + $0x18] sm:$0xff]  ;;  %v387_v9 = vld [vmem:[%s565_s3] sm:$0xff]  ;;  %v381_v10 = vld [vmem:[#allocation2 + $0x10] sm:$0xff]  ;;  %v61_v20 = vand.u32 127, %v60_v17  ;;  %s497_s18 = smov [#allocation7]   ;;  %s296_s22 = sshll.u32 %s569_s7, 4  ;;  %s297_s22 = int_to_ptr.hbm [resolvable:$true] %s296_s22 }
   0xf   :  { %185 = vmatpush.bf16.msra.mxu1 %v386_v3  ;;  %131 = vmatpush.bf16.msra.mxu0 %v387_v9  ;;  %v111_v11 = vld [vmem:[%s563_s1] sm:$0xf]  ;;  %v380_v12 = vld [vmem:[#allocation2 + $0x8] sm:$0xff]  ;;  %v395_v14 = vld [vmem:[#allocation5 + $0x38] sm:$0xff]  ;;  %s294_s19 = sshll.u32 %s497_s18, 4  ;;  %s295_s19 = int_to_ptr.vmem [resolvable:$true] %s294_s19 }
  0x10   :  { %v379_v13 = vld [vmem:[#allocation2] sm:$0xff]  ;;  %273 = vmatpush.bf16.msra.mxu2 %v395_v14  ;;  %v394_v15 = vld [vmem:[#allocation5 + $0x30] sm:$0xff]  ;;  %v393_v16 = vld [vmem:[#allocation5 + $0x28] sm:$0xff] }
  0x11   :  { %v392_v19 = vld [vmem:[#allocation5 + $0x20] sm:$0xff]  ;;  %v391_v32 = vld [vmem:[#allocation5 + $0x18] sm:$0xff]  ;;  %v390_v33 = vld [vmem:[#allocation5 + $0x10] sm:$0xff] }
  0x12   :  { %314 = vmatmul.msk.bf16.vlgmr.msra.gmra.mxu0 %vm120_vm0, %v111_v11  ;;  %v389_v36 = vld [vmem:[#allocation5 + $0x8] sm:$0xff]  ;;  %v388_v37 = vld [vmem:[#allocation5] sm:$0xff] }
  0x13   :  { %186 = vmatpush.bf16.msra.mxu1 %v385_v4  ;;  %v409_v38 = vld [vmem:[%s566_s4] ss:$0 sm:$0xff] }
  0x14   :  { %274 = vmatpush.bf16.msra.mxu2 %v394_v15  ;;  %v410_v45 = vld [vmem:[%s568_s6] ss:$0 sm:$0xff] }
  0x16   :  { %406 = vset.pattern.permute.xlu0 %v495_v6 }
  0x17   :  { %74 = vperm.xlu0 %406, %v62_v2   ;;  %187 = vmatpush.bf16.msra.mxu1 %v384_v5 }
  0x18   :  { %275 = vmatpush.bf16.msra.mxu2 %v393_v16 }
  0x1b   :  { %188 = vmatpush.bf16.msra.mxu1 %v383_v7 }
  0x1c   :  { %276 = vmatpush.bf16.msra.mxu2 %v392_v19 }
  0x1f   :  { %408 = vset.pattern.permute.xlu0 %v494_v1  ;;  %189 = vmatpush.bf16.msra.mxu1 %v382_v8 }
  0x20   :  { %277 = vmatpush.bf16.msra.mxu2 %v391_v32 }
  0x23   :  { %190 = vmatpush.bf16.msra.mxu1 %v381_v10 }
  0x24   :  { %278 = vmatpush.bf16.msra.mxu2 %v390_v33 }
  0x27   :  { %191 = vmatpush.bf16.msra.mxu1 %v380_v12 }
  0x28   :  { %279 = vmatpush.bf16.msra.mxu2 %v389_v36 }
  0x2b   :  { %192 = vmatpush.bf16.msra.mxu1 %v379_v13 }
  0x2c   :  { %280 = vmatpush.bf16.msra.mxu2 %v388_v37 }
  0x80   :  { %v65_v18 = vpop.permute.xlu0 %64  ;;  %v86_v22 = vpop.permute.xlu1 %85 }
  0x81   :  { %vm66_vm1 = vcmp.eq.s32.totalorder %v61_v20, %v65_v18  ;;  %vm87_vm3 = vcmp.eq.s32.totalorder %v61_v20, %v86_v22 }
  0x82   :  { %v307_v24 = vsel %vm66_vm1, 1.0, %v496_v23  ;;  %v309_v28 = vsel %vm87_vm3, 1.0, %v496_v23 }
  0x89   :  { %v75_v21 = vpop.permute.xlu0 %74 }
  0x8a   :  { %vm76_vm2 = vcmp.eq.s32.totalorder %v61_v20, %v75_v21 }
  0x8b   :  { %v308_v25 = vsel %vm76_vm2, 1.0, %v496_v23 }
  0x8c   :  { %v82_v26 = vadd.f32 %v308_v25, %v307_v24 }
  0x8e   :  { %v83_v27 = vpack.c.bf16 %v82_v26, %v82_v26 }
  0x8f   :  { %v133_v34 = vpop.f32.mrf.mxu0 }
  0x90   :  { %v91_v29 = vunpack.c.l.bf16 %v83_v27 }
  0x92   :  { %v93_v30 = vadd.f32 %v309_v28, %v91_v29 }
  0x94   :  { %v94_v31 = vpack.c.bf16 %v93_v30, %v93_v30 }
  0x96   :  { %193 = vmatmul.bf16.vlgmr.msra.gmra.mxu1 %v94_v31 }
  0x97   :  { %v135_v35 = vpop.f32.mrf.mxu0 }
 0x113   :  { %v194_v39 = vpop.f32.mrf.mxu1 }
 0x114   :  { %v195_v40 = vadd.f32 %v194_v39, %v133_v34 }
 0x116   :  { %v202_v41 = vadd.f32 %v409_v38, %v195_v40 }
 0x118   :  { %v203_v42 = vmax.f32 %v202_v41, 0.0 }
 0x11a   :  { %v204_v43 = vpack.c.bf16 %v203_v42, %v203_v42 }
 0x11b   :  { %v196_v44 = vpop.f32.mrf.mxu1 }
 0x11c   :  { %281 = vmatmul.bf16.vlgmr.msra.gmra.mxu2 %v204_v43 }
 0x19f   :  { %v282_v46 = vpop.f32.mrf.mxu2 }
 0x1a0   :  { %v283_v47 = vadd.f32 %v410_v45, %v282_v46 }
 0x1a2   :  { %v286_v48 = vadd.f32 %v283_v47, %v203_v42 }
 0x1a4   :  { %v287_v49 = vpack.c.bf16 %v286_v48, %v286_v48 }
 0x1a6   :  { %288 = vst [vmem:[#allocation7] sm:$0xf] %v287_v49 }
 0x1a7   :  { %v284_v50 = vpop.f32.mrf.mxu2  ;;  %299 = dma.vmem_to_hbm [thread:$0]  %s295_s19, 64, %s297_s22, [#allocation4]  }
 0x1a8   :  { %487 = dma.done.wait [#allocation4], 64  }
 0x1a9   :  { %488 = vsyncadd [#allocation4], 4294967232 }
 0x1aa   :  { %304 = vsyncpa [#allocation3], 1 }
 0x1ab   :  { %305 = vsyncpa [#allocation6], 1 }
 0x1ac   :  { %306 = vsyncpa [#allocation4], 1 }

</bundles_post_ra>
